<compile_context>
chip_gen: v7x
topology: tpu7x:2x2x1
jax: 0.10.0
libtpu: 0.0.40
codegen_flags: <defaults>
</compile_context>

<pallas_src>
import math
from functools import partial

import jax
import jax.numpy as jnp
from jax.experimental import pallas as pl
from jax.experimental.pallas import tpu as pltpu

_K = math.sqrt(2.0 / math.pi)      # sqrt(2/pi)
_C = 0.044715 * _K                 # folded cubic coefficient: K * 0.044715


def _gelu_kernel(x_ref, o_ref, *, compute_dtype):
    x = x_ref[...].astype(compute_dtype)
    # 0.5 * x * (1 + tanh(K*x + K*0.044715*x^3)) -- single EUP transcendental.
    inner = x * (_K + _C * (x * x))
    o_ref[...] = (0.5 * x * (1.0 + jnp.tanh(inner))).astype(o_ref.dtype)


def _device_kind() -> str:
    try:
        return jax.devices()[0].device_kind.lower()
    except Exception:
        return ""


def _hw_params():
    """(target_block_bytes, vmem_limit_bytes, bf16_native) per TPU generation."""
    kind = _device_kind()
    if "v7" in kind:
        # 8 MiB blocks, double-buffered in+out = 32 MiB -> raise the scoped limit.
        return 8 << 20, 40 << 20, True
    if "v6" in kind:
        return 4 << 20, 32 << 20, True
    # v5e / v5p / v4 / unknown: stay within the 16 MiB default scoped VMEM,
    # and no bf16 VPU/EUP -> keep f32 compute.
    return 2 << 20, None, False


def _sublane_multiple(dtype) -> int:
    # packed vreg rows: 8 (32-bit), 16 (16-bit), 32 (8-bit)
    return {4: 8, 2: 16, 1: 32}.get(jnp.dtype(dtype).itemsize, 8)


def _as_2d(x):
    """View x as a 2D (rows, cols) slab with a *free* reshape; never pads."""
    n = x.size
    for cols in (4096, 2048, 1024, 512, 256, 128):   # lane-dense candidates
        if n % cols == 0:
            return x.reshape(n // cols, cols), n // cols, cols
    # Ragged fallback: keep the trailing dim (full-dim block on the lane axis),
    # no pad / slice passes over HBM.
    # TODO(synk): lane-pack ragged tails for better lane utilization.
    if x.ndim == 0:
        return x.reshape(1, 1), 1, 1
    cols = x.shape[-1]
    return x.reshape(n // cols, cols), n // cols, cols


def _round_up(v: int, m: int) -> int:
    return ((v + m - 1) // m) * m


def _pick_block_rows(rows, cols, itemsize, sub, target_block_bytes, min_steps=8):
    if rows <= sub:
        return rows                              # single full-height block (full-dim rule)
    bytes_per_row = max(1, itemsize * cols)
    target = max(sub, (target_block_bytes // bytes_per_row) // sub * sub)
    # Keep >= min_steps grid steps so the in/out DMAs overlap compute and both
    # TensorCores (v7x) get blocks; round to a sublane multiple.
    cap = max(sub, _round_up(pl.cdiv(rows, min_steps), sub))
    tr = min(target, cap)
    return max(sub, min(tr, _round_up(rows, sub)))


def gelu_gpt(x: jax.Array, *, target_block_bytes: int | None = None) -> jax.Array:
    """GPT-style tanh GeLU, computed in a Pallas TPU kernel.

    Accepts any shape; internally views the input as a lane-dense 2D slab
    (free reshape, never padded), runs a row-tiled elementwise kernel with
    full-width blocks, and restores the original shape.
    """
    orig_shape = x.shape
    dtype = x.dtype
    if x.size == 0:
        return x

    block_bytes, vmem_limit, bf16_native = _hw_params()
    if target_block_bytes is None:
        target_block_bytes = block_bytes

    compute_dtype = (
        jnp.bfloat16 if (dtype == jnp.bfloat16 and bf16_native) else jnp.float32
    )

    itemsize = jnp.dtype(dtype).itemsize
    sub = _sublane_multiple(dtype)
    x2d, rows, cols = _as_2d(x)
    tr = _pick_block_rows(rows, cols, itemsize, sub, target_block_bytes)
    grid = (pl.cdiv(rows, tr),)

    out2d = pl.pallas_call(
        partial(_gelu_kernel, compute_dtype=compute_dtype),
        out_shape=jax.ShapeDtypeStruct((rows, cols), dtype),
        grid_spec=pltpu.PrefetchScalarGridSpec(
            num_scalar_prefetch=0,
            grid=grid,
            in_specs=[pl.BlockSpec((tr, cols), lambda i: (i, 0))],
            out_specs=pl.BlockSpec((tr, cols), lambda i: (i, 0)),
        ),
        compiler_params=pltpu.CompilerParams(
            dimension_semantics=("parallel",),
            vmem_limit_bytes=vmem_limit,
        ),
    )(x2d)

    return out2d.reshape(orig_shape)


def _gelu_ref(x):
    k = math.sqrt(2.0 / math.pi)
    return 0.5 * x * (1.0 + jnp.tanh(k * (x + 0.044715 * jnp.power(x, 3.0))))


if __name__ == "__main__":
    key = jax.random.PRNGKey(0)

    # NCHW-style activation tensor (fast path: free lane-dense reshape)
    x = jax.random.normal(key, (2, 4, 16, 16), dtype=jnp.float32)
    out = jax.block_until_ready(gelu_gpt(x))
    ref = _gelu_ref(x)
    assert out.shape == x.shape
    assert jnp.allclose(out, ref, atol=1e-5, rtol=1e-5)

    # Ragged shape (exercises the no-pad fallback + partial last block)
    x2 = jax.random.normal(jax.random.PRNGKey(1), (3, 5, 7), dtype=jnp.float32)
    out2 = jax.block_until_ready(gelu_gpt(x2))
    ref2 = _gelu_ref(x2)
    assert out2.shape == x2.shape
    assert jnp.allclose(out2, ref2, atol=1e-5, rtol=1e-5)

    # bf16 path (native bf16 compute on v6e/v7x, f32 upcast elsewhere)
    x3 = jax.random.normal(jax.random.PRNGKey(2), (8, 128), dtype=jnp.bfloat16)
    out3 = jax.block_until_ready(gelu_gpt(x3))
    ref3 = _gelu_ref(x3.astype(jnp.float32)).astype(jnp.bfloat16)
    assert out3.shape == x3.shape
    assert jnp.allclose(
        out3.astype(jnp.float32), ref3.astype(jnp.float32), atol=3e-2, rtol=3e-2
    )

    print("KERNEL_OK")
</pallas_src>

<mosaic_0001>
module attributes {stable_mosaic.version = 11 : i64} {
  func.func @_gelu_kernel(%arg0: i32, %arg1: memref<1x2048xf32, #tpu.memory_space<vmem>>, %arg2: memref<1x2048xf32, #tpu.memory_space<vmem>>) attributes {dimension_semantics = [#tpu.dimension_semantics<parallel>], iteration_bounds = array<i64: 1>, scalar_prefetch = 0 : i64, scratch_operands = 0 : i64, tpu.core_type = #tpu.core_type<tc>, window_params = [{transform_indices = @transform_0, window_bounds = array<i64: 1, 2048>}, {transform_indices = @transform_1, window_bounds = array<i64: 1, 2048>}]} {
    %c0 = arith.constant 0 : index
    %c0_0 = arith.constant 0 : index
    %0 = vector.load %arg1[%c0, %c0_0] : memref<1x2048xf32, #tpu.memory_space<vmem>>, vector<1x2048xf32>
    %1 = arith.mulf %0, %0 : vector<1x2048xf32>
    %cst = arith.constant 0.0356774069 : f32
    %2 = vector.broadcast %cst : f32 to vector<1x2048xf32>
    %3 = arith.mulf %2, %1 : vector<1x2048xf32>
    %cst_1 = arith.constant 0.797884583 : f32
    %4 = vector.broadcast %cst_1 : f32 to vector<1x2048xf32>
    %5 = arith.addf %4, %3 : vector<1x2048xf32>
    %6 = arith.mulf %0, %5 : vector<1x2048xf32>
    %cst_2 = arith.constant 5.000000e-01 : f32
    %7 = vector.broadcast %cst_2 : f32 to vector<1x2048xf32>
    %8 = arith.mulf %7, %0 : vector<1x2048xf32>
    %9 = math.tanh %6 : vector<1x2048xf32>
    %cst_3 = arith.constant 1.000000e+00 : f32
    %10 = vector.broadcast %cst_3 : f32 to vector<1x2048xf32>
    %11 = arith.addf %10, %9 : vector<1x2048xf32>
    %12 = arith.mulf %8, %11 : vector<1x2048xf32>
    %c0_4 = arith.constant 0 : index
    %c0_5 = arith.constant 0 : index
    %13 = vector.load %arg2[%c0_4, %c0_5] : memref<1x2048xf32, #tpu.memory_space<vmem>>, vector<1x2048xf32>
    tpu.vector_store %arg2[%c0_4, %c0_5], %12 {strides = array<i32>} : memref<1x2048xf32, #tpu.memory_space<vmem>>, vector<1x2048xf32>,
    return
  }
  func.func @transform_0(%arg0: i32) -> (i32, i32) {
    %c0_i32 = arith.constant 0 : i32
    %c0_i32_0 = arith.constant 0 : i32
    return %arg0, %c0_i32 : i32, i32
  }
  func.func @transform_1(%arg0: i32) -> (i32, i32) {
    %c0_i32 = arith.constant 0 : i32
    %c0_i32_0 = arith.constant 0 : i32
    return %arg0, %c0_i32 : i32, i32
  }
}

</mosaic_0001>

<bundles_post_ra>
// kernel: tpu_custom_call.1
= control target key start
LH: loop header
LB: loop body
LE: loop exit
PB: predicated region body
PF: predicated region fallthrough
CT: control target
= control target key end

     0   :  { %6 = vsyncpa [#allocation3], 0  ;;  %s146_s0 = inlined_call_operand.hbm [shape: f32[1,2048], index: 0, kind: input, shape index: {}]   ;;  %s147_s1 = inlined_call_operand.hbm [shape: f32[1,2048], index: 1, kind: output, shape index: {}]  }
   0x1   :  { %7 = vsyncpa [#allocation4], 0  ;;  %s110_s6 = smov [#allocation2]   ;;  %s62_s10 = scalar_lea.hbm %s146_s0, 256 }
   0x2   :  { %s14_s7 = sshll.u32 %s110_s6, 4  ;;  %p63_p0 = scmp.ne.s32.totalorder %s146_s0, %s62_s10  ;;  %s15_s7 = int_to_ptr.vmem [resolvable:$true] %s14_s7 }
   0x3   :  { %p66_p1 = scmp.lt.u32.totalorder %s62_s10, %s146_s0 }
   0x5   :  { %p68_p2 = pnand %p66_p1, %p63_p0 }
   0x7   :  { %71 = shalt.err (!%p68_p2)
}
   0x8   :  { %s72_s15 = scalar_lea.vmem %s15_s7, 256  ;;  %p77_p4 = scmp.lt.s32.totalorder %s15_s7, %s15_s7 }
   0x9   :  { %p73_p3 = scmp.ne.s32.totalorder %s15_s7, %s72_s15  ;;  %p78_p5 = scmp.lt.s32.totalorder %s72_s15, %s72_s15 }
   0xb   :  { %p79_p6 = por %p78_p5, %p77_p4 }
   0xd   :  { %p80_p7 = pnand %p79_p6, %p73_p3 }
   0xf   :  { %83 = shalt.err (!%p80_p7)
}
  0x10   :  { %17 = dma.hbm_to_vmem [thread:$0]  %s146_s0, 256, %s15_s7, [#allocation3]  }
  0x11   :  { %106 = dma.done.wait [#allocation3], 256  }
  0x12   :  { %107 = vsyncadd [#allocation3], 4294967040  ;;  %v21_v0 = vld [vmem:[#allocation2] sm:$0xff]  ;;  %v22_v1 = vld [vmem:[#allocation2 + $0x8] sm:$0xff]  ;;  %s111_s0 = smov [#allocation5]  }
  0x13   :  { %v23_v2 = vmul.f32 %v21_v0, %v21_v0  ;;  %v24_v3 = vmul.f32 %v22_v1, %v22_v1  ;;  %v31_v10 = vmul.f32 0.5, %v21_v0  ;;  %v32_v12 = vmul.f32 0.5, %v22_v1  ;;  %s47_s18 = sshll.u32 %s111_s0, 4  ;;  %s48_s18 = int_to_ptr.vmem [resolvable:$true] %s47_s18 }
  0x14   :  { %s84_s19 = scalar_lea.vmem %s48_s18, 256  ;;  %p89_p9 = scmp.lt.s32.totalorder %s48_s18, %s48_s18 }
  0x15   :  { %v25_v4 = vmul.f32 0.035677407, %v23_v2  ;;  %v26_v5 = vmul.f32 0.035677407, %v24_v3  ;;  %p85_p8 = scmp.ne.s32.totalorder %s48_s18, %s84_s19  ;;  %p90_p10 = scmp.lt.s32.totalorder %s84_s19, %s84_s19 }
  0x17   :  { %v27_v6 = vadd.f32 0.7978846, %v25_v4  ;;  %v28_v7 = vadd.f32 0.7978846, %v26_v5  ;;  %p91_p11 = por %p90_p10, %p89_p9 }
  0x19   :  { %v29_v8 = vmul.f32 %v27_v6, %v21_v0  ;;  %v30_v9 = vmul.f32 %v28_v7, %v22_v1  ;;  %p92_p12 = pnand %p91_p11, %p85_p8 }
  0x1b   :  { %58 = vtanh.f32 %v29_v8 }
  0x1c   :  { %60 = vtanh.f32 %v30_v9 }
  0x25   :  { %v59_v11 = vpop.eup %58 }
  0x26   :  { %v61_v13 = vpop.eup %60  ;;  %v35_v14 = vadd.f32 1.0, %v59_v11 }
  0x27   :  { %v36_v15 = vadd.f32 1.0, %v61_v13 }
  0x28   :  { %v37_v16 = vmul.f32 %v35_v14, %v31_v10 }
  0x29   :  { %v38_v17 = vmul.f32 %v36_v15, %v32_v12 }
  0x2a   :  { %39 = vst [vmem:[#allocation5] sm:$0xff] %v37_v16 }
  0x2b   :  { %40 = vst [vmem:[#allocation5 + $0x8] sm:$0xff] %v38_v17 }
  0x2c   :  { %95 = shalt.err (!%p92_p12)
}
  0x2d   :  { %s96_s22 = scalar_lea.hbm %s147_s1, 256 }
  0x2e   :  { %p97_p13 = scmp.ne.s32.totalorder %s147_s1, %s96_s22  ;;  %p100_p0 = scmp.lt.u32.totalorder %s96_s22, %s147_s1 }
  0x30   :  { %p102_p1 = pnand %p100_p0, %p97_p13 }
  0x32   :  { %105 = shalt.err (!%p102_p1)
}
  0x33   :  { %50 = dma.vmem_to_hbm [thread:$0]  %s48_s18, 256, %s147_s1, [#allocation4]  }
  0x34   :  { %108 = dma.done.wait [#allocation4], 256  }
  0x35   :  { %109 = vsyncadd [#allocation4], 4294967040 }
  0x36   :  { %54 = vsyncpa [#allocation3], 1 }
  0x37   :  { %55 = vsyncpa [#allocation4], 1 }

</bundles_post_ra>
